<compile_context>
chip_gen: v7x
topology: tpu7x:2x2x1
jax: 0.10.0
libtpu: 0.0.40
codegen_flags: <defaults>
</compile_context>

<pallas_src>
import functools

import jax
import jax.numpy as jnp
from jax.experimental import pallas as pl
from jax.experimental.pallas import tpu as pltpu


def _round_up(x, m):
    return (x + m - 1) // m * m


def _cdiv(a, b):
    return (a + b - 1) // b


def _vmem_padded_bytes(shape, dtype):
    """Rough VMEM footprint of one buffer (last dim -> 128 lanes, 2nd minor -> 8 sublanes)."""
    shape = tuple(int(d) for d in shape)
    if len(shape) == 1:
        shape = (1,) + shape
    lead = 1
    for d in shape[:-2]:
        lead *= d
    return (lead * _round_up(shape[-2], 8) * _round_up(shape[-1], 128)
            * jnp.dtype(dtype).itemsize)


def _conv_gn_mish_kernel(x_ref, w_ref, p_ref, g_ref, gt_ref, o_ref, *,
                         K, T, S, N, Bblk, inv_n, eps):
    # x_ref : (C_in_pad, Lpad)      packed input row (Bblk segments of stride S)
    # w_ref : (K, C_out, C_in_pad)  conv taps, compute dtype (bf16 by default)
    # p_ref : (C_out, 4)            f32 [bias, gamma, beta, 0]
    # g_ref : (C_out, n_groups)     f32 one-hot channel -> group
    # gt_ref: (n_groups, C_out)     f32 transpose of g_ref
    # o_ref : (Bblk, C_out, T)      output block (PyTorch (B, C_out, T) layout)
    x = x_ref[...]

    # ---- Conv1d: K accumulating MXU dots, f32 accumulation only ----
    acc = jnp.dot(w_ref[0], x[:, 0:N], preferred_element_type=jnp.float32)
    for k in range(1, K):
        acc += jnp.dot(w_ref[k], x[:, k:k + N],
                       preferred_element_type=jnp.float32)

    bias = p_ref[:, 0:1]
    gamma = p_ref[:, 1:2]
    beta = p_ref[:, 2:3]
    acc = acc + bias                                            # (C_out, N) f32

    # ---- Batched GroupNorm statistics for all Bblk batch elements ----
    # memb[j, b] = 1 iff lane j is a valid time column of batch b
    col = jax.lax.broadcasted_iota(jnp.int32, (N, Bblk), 0)
    bidx = jax.lax.broadcasted_iota(jnp.int32, (N, Bblk), 1)
    start = bidx * S
    memb = ((col >= start) & (col < start + T)).astype(jnp.float32)     # (N, Bblk)

    sums = jnp.dot(acc, memb, preferred_element_type=jnp.float32)       # (C_out, Bblk)
    sumsq = jnp.dot(acc * acc, memb, preferred_element_type=jnp.float32)
    gsum = jnp.dot(gt_ref[...], sums, preferred_element_type=jnp.float32)   # (n_groups, Bblk)
    gsq = jnp.dot(gt_ref[...], sumsq, preferred_element_type=jnp.float32)
    mean = jnp.dot(g_ref[...], gsum, preferred_element_type=jnp.float32) * inv_n  # (C_out, Bblk)
    ex2 = jnp.dot(g_ref[...], gsq, preferred_element_type=jnp.float32) * inv_n
    var = jnp.maximum(ex2 - mean * mean, 0.0)                   # clamp: no NaN rsqrt
    inv_std = jax.lax.rsqrt(var + eps)

    # fold GN affine into one scale/shift per (channel, batch)
    scale = inv_std * gamma                                     # (C_out, Bblk)
    shift = beta - mean * scale

    # ---- per-batch normalize + Mish + store (stats already batched above) ----
    for b in range(Bblk):
        y = acc[:, b * S:b * S + T] * scale[:, b:b + 1] + shift[:, b:b + 1]
        # Mish: y * tanh(softplus(y)) == y*(t^2+2t)/(t^2+2t+2), t = exp(y).
        # Exact divide (the approx reciprocal was the previous accuracy bug);
        # for y > 20, mish(y) ~= y (also guards exp overflow).
        t = jnp.exp(jnp.minimum(y, 20.0))
        u = t * (t + 2.0)
        out = jnp.where(y > 20.0, y, y * (u / (u + 2.0)))
        o_ref[b] = out.astype(o_ref.dtype)


def conv1d_block(x, weight, bias, gamma, beta, *, n_groups=8, eps=1e-5,
                 batch_block=None, compute_dtype=jnp.bfloat16):
    """x: (B, C_in, T); weight: (C_out, C_in, K); bias/gamma/beta: (C_out,)."""
    B, C_in, T = x.shape
    C_out, w_cin, K = weight.shape
    assert w_cin == C_in
    assert C_out % n_groups == 0, "out_channels must be divisible by n_groups"
    assert K % 2 == 1, "kernel_size must be odd to preserve T with padding=K//2"

    # sublane multiple for the contraction dim: 16 for bf16, 8 for f32
    sub = 8 * (4 // jnp.dtype(compute_dtype).itemsize)
    C_in_pad = _round_up(C_in, sub)
    S = T + K - 1                      # per-batch segment stride on the lane axis
    pad_left = K // 2

    # Batch block: >= 2 grid steps when B >= 2 so both v7x TensorCores get work.
    if batch_block is not None:
        Bblk = max(1, min(int(batch_block), B))
    elif B <= 1:
        Bblk = 1
    else:
        Bblk = max(1, min(8, B // 2))
    G = _cdiv(B, Bblk)
    Bp = G * Bblk
    N = _round_up(Bblk * S, 128)       # matmul lane width (valid cols = Bblk*S)
    Lpad = _round_up(N + K - 1, 128)   # packed input row length (incl. tap halo)

    # ---- pack input: (B, C_in, T) -> (G, C_in_pad, Lpad), segments of stride S ----
    xp = jnp.pad(x, ((0, Bp - B), (0, C_in_pad - C_in),
                     (pad_left, (K - 1) - pad_left)))            # (Bp, C_in_pad, S)
    xp = xp.reshape(G, Bblk, C_in_pad, S).transpose(0, 2, 1, 3)
    xp = xp.reshape(G, C_in_pad, Bblk * S)
    xp = jnp.pad(xp, ((0, 0), (0, 0), (0, Lpad - Bblk * S))).astype(compute_dtype)

    # ---- weight taps: (C_out, C_in, K) -> (K, C_out, C_in_pad), compute dtype ----
    w = jnp.pad(weight, ((0, 0), (0, C_in_pad - C_in), (0, 0)))
    w = jnp.transpose(w, (2, 0, 1)).astype(compute_dtype)

    # conv bias / GN gamma / GN beta packed into one small f32 operand
    params = jnp.stack([bias, gamma, beta, jnp.zeros_like(bias)],
                       axis=1).astype(jnp.float32)               # (C_out, 4)

    # compact one-hot group maps (replaces the old (C_out, C_out) smear matrix)
    cg = C_out // n_groups
    ids = jnp.arange(C_out) // cg
    gmap = (ids[:, None] == jnp.arange(n_groups)[None, :]).astype(jnp.float32)
    gmap_t = jnp.transpose(gmap)

    inv_n = 1.0 / float(cg * T)

    kernel = functools.partial(
        _conv_gn_mish_kernel, K=K, T=T, S=S, N=N, Bblk=Bblk,
        inv_n=inv_n, eps=float(eps))

    # VMEM budget derived from block sizes (double-buffered I/O + constants +
    # f32 accumulator/temporaries); capped so defaults also fit v7x's 64 MiB.
    est = (2 * _vmem_padded_bytes((C_in_pad, Lpad), compute_dtype)
           + 2 * _vmem_padded_bytes((Bblk, C_out, T), x.dtype)
           + 2 * _vmem_padded_bytes((K, C_out, C_in_pad), compute_dtype)
           + 2 * (_vmem_padded_bytes((C_out, 4), jnp.float32)
                  + _vmem_padded_bytes((C_out, n_groups), jnp.float32)
                  + _vmem_padded_bytes((n_groups, C_out), jnp.float32))
           + 4 * _vmem_padded_bytes((C_out, N), jnp.float32))
    vmem_limit = int(min(max(2 * est, 32 * 1024 * 1024), 60 * 1024 * 1024))

    out = pl.pallas_call(
        kernel,
        out_shape=jax.ShapeDtypeStruct((Bp, C_out, T), x.dtype),
        grid_spec=pltpu.PrefetchScalarGridSpec(
            num_scalar_prefetch=0,
            grid=(G,),
            in_specs=[
                pl.BlockSpec((None, C_in_pad, Lpad), lambda i: (i, 0, 0)),
                pl.BlockSpec((K, C_out, C_in_pad), lambda i: (0, 0, 0)),
                pl.BlockSpec((C_out, 4), lambda i: (0, 0)),
                pl.BlockSpec((C_out, n_groups), lambda i: (0, 0)),
                pl.BlockSpec((n_groups, C_out), lambda i: (0, 0)),
            ],
            out_specs=pl.BlockSpec((Bblk, C_out, T), lambda i: (i, 0, 0)),
        ),
        compiler_params=pltpu.CompilerParams(
            dimension_semantics=("parallel",),
            vmem_limit_bytes=vmem_limit),
    )(xp, w, params, gmap, gmap_t)

    # slice off batch padding (cheap XLA slice)
    return out[:B]


def _reference(x, weight, bias, gamma, beta, n_groups=8, eps=1e-5):
    """Pure-JAX reference matching PyTorch Conv1d/GroupNorm/Mish semantics."""
    K = weight.shape[-1]
    y = jax.lax.conv_general_dilated(
        x, weight, window_strides=(1,), padding=[(K // 2, K // 2)],
        dimension_numbers=("NCH", "OIH", "NCH"))
    y = y + bias[None, :, None]
    B, C, T = y.shape
    yg = y.reshape(B, n_groups, C // n_groups, T)
    mean = yg.mean(axis=(2, 3), keepdims=True)
    var = ((yg - mean) ** 2).mean(axis=(2, 3), keepdims=True)
    yn = ((yg - mean) / jnp.sqrt(var + eps)).reshape(B, C, T)
    yn = yn * gamma[None, :, None] + beta[None, :, None]
    return yn * jnp.tanh(jax.nn.softplus(yn))


if __name__ == "__main__":
    B, C_in, C_out, T, K, n_groups = 2, 8, 16, 16, 3, 8

    key = jax.random.PRNGKey(0)
    k1, k2, k3 = jax.random.split(key, 3)
    x = jax.random.normal(k1, (B, C_in, T), dtype=jnp.float32)
    # deterministic parameter init (synthetic; roughly PyTorch's uniform scale)
    fan_in = C_in * K
    bound = 1.0 / (fan_in ** 0.5)
    weight = jax.random.uniform(k2, (C_out, C_in, K), jnp.float32, -bound, bound)
    bias = jax.random.uniform(k3, (C_out,), jnp.float32, -bound, bound)
    gamma = jnp.ones((C_out,), jnp.float32)   # GroupNorm affine defaults
    beta = jnp.zeros((C_out,), jnp.float32)

    ref = _reference(x, weight, bias, gamma, beta, n_groups=n_groups)
    # reference on bf16-rounded operands (what the bf16 fast path actually sees)
    ref_b = _reference(x.astype(jnp.bfloat16).astype(jnp.float32),
                       weight.astype(jnp.bfloat16).astype(jnp.float32),
                       bias, gamma, beta, n_groups=n_groups)

    # 1) exactness: f32 MXU operands vs f32 reference
    out_exact = conv1d_block(x, weight, bias, gamma, beta, n_groups=n_groups,
                             compute_dtype=jnp.float32)
    out_exact = jax.block_until_ready(out_exact)
    assert out_exact.shape == (B, C_out, T)
    assert jnp.allclose(out_exact, ref, rtol=1e-3, atol=1e-3), \
        "f32 path mismatch vs reference"

    # 2) default fast path: bf16 MXU operands, f32 accumulation
    out_fast = conv1d_block(x, weight, bias, gamma, beta, n_groups=n_groups)
    out_fast = jax.block_until_ready(out_fast)
    assert out_fast.shape == (B, C_out, T)
    assert jnp.allclose(out_fast, ref_b, rtol=1e-3, atol=1e-3), \
        "bf16 path mismatch vs bf16-input reference"
    assert jnp.allclose(out_fast, ref, rtol=5e-2, atol=5e-2), \
        "bf16 path deviates too much from f32 reference"

    print("KERNEL_OK")
</pallas_src>

<mosaic_0001>
module attributes {stable_mosaic.version = 11 : i64} {
  func.func @_conv_gn_mish_kernel(%arg0: i32, %arg1: memref<1x8x256xf32, #tpu.memory_space<vmem>>, %arg2: memref<3x16x8xf32, #tpu.memory_space<vmem>>, %arg3: memref<16x4xf32, #tpu.memory_space<vmem>>, %arg4: memref<16x8xf32, #tpu.memory_space<vmem>>, %arg5: memref<8x16xf32, #tpu.memory_space<vmem>>, %arg6: memref<1x16x16xf32, #tpu.memory_space<vmem>>) attributes {dimension_semantics = [#tpu.dimension_semantics<parallel>], iteration_bounds = array<i64: 2>, scalar_prefetch = 0 : i64, scratch_operands = 0 : i64, tpu.core_type = #tpu.core_type<tc>, window_params = [{transform_indices = @transform_0, window_bounds = array<i64: 1, 8, 256>}, {pipeline_mode = #tpu.pipeline_mode<synchronous>, transform_indices = @transform_1, window_bounds = array<i64: 3, 16, 8>}, {pipeline_mode = #tpu.pipeline_mode<synchronous>, transform_indices = @transform_2, window_bounds = array<i64: 16, 4>}, {pipeline_mode = #tpu.pipeline_mode<synchronous>, transform_indices = @transform_3, window_bounds = array<i64: 16, 8>}, {pipeline_mode = #tpu.pipeline_mode<synchronous>, transform_indices = @transform_4, window_bounds = array<i64: 8, 16>}, {transform_indices = @transform_5, window_bounds = array<i64: 1, 16, 16>}]} {
    %c0 = arith.constant 0 : index
    %c0_0 = arith.constant 0 : index
    %c0_1 = arith.constant 0 : index
    %0 = vector.load %arg1[%c0, %c0_0, %c0_1] : memref<1x8x256xf32, #tpu.memory_space<vmem>>, vector<1x8x256xf32>
    %1 = vector.shape_cast %0 : vector<1x8x256xf32> to vector<8x256xf32>
    %c0_2 = arith.constant 0 : index
    %c0_3 = arith.constant 0 : index
    %c0_4 = arith.constant 0 : index
    %2 = vector.load %arg2[%c0_2, %c0_3, %c0_4] : memref<3x16x8xf32, #tpu.memory_space<vmem>>, vector<1x16x8xf32>
    %3 = vector.shape_cast %2 : vector<1x16x8xf32> to vector<16x8xf32>
    %4 = vector.extract_strided_slice %1 {offsets = [0, 0], sizes = [8, 128], strides = [1, 1]} : vector<8x256xf32> to vector<8x128xf32>
    %cst = arith.constant dense<0.000000e+00> : vector<16x128xf32>
    %5 = tpu.matmul %3, %4, %cst {dimension_numbers = #tpu.dot_dimension_numbers<[1], [0], [0], [1], [0, 0, 1, 1], [], []>} : vector<16x8xf32>, vector<8x128xf32>, vector<16x128xf32> -> vector<16x128xf32>
    %c1 = arith.constant 1 : index
    %c0_5 = arith.constant 0 : index
    %c0_6 = arith.constant 0 : index
    %6 = vector.load %arg2[%c1, %c0_5, %c0_6] : memref<3x16x8xf32, #tpu.memory_space<vmem>>, vector<1x16x8xf32>
    %7 = vector.shape_cast %6 : vector<1x16x8xf32> to vector<16x8xf32>
    %8 = vector.extract_strided_slice %1 {offsets = [0, 1], sizes = [8, 128], strides = [1, 1]} : vector<8x256xf32> to vector<8x128xf32>
    %cst_7 = arith.constant dense<0.000000e+00> : vector<16x128xf32>
    %9 = tpu.matmul %7, %8, %cst_7 {dimension_numbers = #tpu.dot_dimension_numbers<[1], [0], [0], [1], [0, 0, 1, 1], [], []>} : vector<16x8xf32>, vector<8x128xf32>, vector<16x128xf32> -> vector<16x128xf32>
    %10 = arith.addf %5, %9 : vector<16x128xf32>
    %c2 = arith.constant 2 : index
    %c0_8 = arith.constant 0 : index
    %c0_9 = arith.constant 0 : index
    %11 = vector.load %arg2[%c2, %c0_8, %c0_9] : memref<3x16x8xf32, #tpu.memory_space<vmem>>, vector<1x16x8xf32>
    %12 = vector.shape_cast %11 : vector<1x16x8xf32> to vector<16x8xf32>
    %13 = vector.extract_strided_slice %1 {offsets = [0, 2], sizes = [8, 128], strides = [1, 1]} : vector<8x256xf32> to vector<8x128xf32>
    %cst_10 = arith.constant dense<0.000000e+00> : vector<16x128xf32>
    %14 = tpu.matmul %12, %13, %cst_10 {dimension_numbers = #tpu.dot_dimension_numbers<[1], [0], [0], [1], [0, 0, 1, 1], [], []>} : vector<16x8xf32>, vector<8x128xf32>, vector<16x128xf32> -> vector<16x128xf32>
    %15 = arith.addf %10, %14 : vector<16x128xf32>
    %c0_11 = arith.constant 0 : index
    %c0_12 = arith.constant 0 : index
    %16 = vector.load %arg3[%c0_11, %c0_12] : memref<16x4xf32, #tpu.memory_space<vmem>>, vector<16x1xf32>
    %c0_13 = arith.constant 0 : index
    %c1_14 = arith.constant 1 : index
    %17 = vector.load %arg3[%c0_13, %c1_14] : memref<16x4xf32, #tpu.memory_space<vmem>>, vector<16x1xf32>
    %c0_15 = arith.constant 0 : index
    %c2_16 = arith.constant 2 : index
    %18 = vector.load %arg3[%c0_15, %c2_16] : memref<16x4xf32, #tpu.memory_space<vmem>>, vector<16x1xf32>
    %19 = vector.broadcast %16 : vector<16x1xf32> to vector<16x128xf32>
    %20 = arith.addf %15, %19 : vector<16x128xf32>
    %21 = tpu.iota {dimensions = array<i32: 0>} : vector<128x1xi32>
    %22 = tpu.iota {dimensions = array<i32: 1>} : vector<128x1xi32>
    %c18_i32 = arith.constant 18 : i32
    %23 = vector.broadcast %c18_i32 : i32 to vector<128x1xi32>
    %24 = arith.muli %22, %23 : vector<128x1xi32>
    %25 = arith.cmpi sge, %21, %24 : vector<128x1xi32>
    %c16_i32 = arith.constant 16 : i32
    %26 = vector.broadcast %c16_i32 : i32 to vector<128x1xi32>
    %27 = arith.addi %24, %26 : vector<128x1xi32>
    %28 = arith.cmpi slt, %21, %27 : vector<128x1xi32>
    %29 = arith.andi %25, %28 : vector<128x1xi1>
    %30 = arith.extui %29 : vector<128x1xi1> to vector<128x1xi32>
    %31 = arith.sitofp %30 : vector<128x1xi32> to vector<128x1xf32>
    %cst_17 = arith.constant dense<0.000000e+00> : vector<16x1xf32>
    %32 = tpu.matmul %20, %31, %cst_17 {dimension_numbers = #tpu.dot_dimension_numbers<[1], [0], [0], [1], [0, 0, 1, 1], [], []>} : vector<16x128xf32>, vector<128x1xf32>, vector<16x1xf32> -> vector<16x1xf32>
    %33 = arith.mulf %20, %20 : vector<16x128xf32>
    %cst_18 = arith.constant dense<0.000000e+00> : vector<16x1xf32>
    %34 = tpu.matmul %33, %31, %cst_18 {dimension_numbers = #tpu.dot_dimension_numbers<[1], [0], [0], [1], [0, 0, 1, 1], [], []>} : vector<16x128xf32>, vector<128x1xf32>, vector<16x1xf32> -> vector<16x1xf32>
    %c0_19 = arith.constant 0 : index
    %c0_20 = arith.constant 0 : index
    %35 = vector.load %arg5[%c0_19, %c0_20] : memref<8x16xf32, #tpu.memory_space<vmem>>, vector<8x16xf32>
    %cst_21 = arith.constant dense<0.000000e+00> : vector<8x1xf32>
    %36 = tpu.matmul %35, %32, %cst_21 {dimension_numbers = #tpu.dot_dimension_numbers<[1], [0], [0], [1], [0, 0, 1, 1], [], []>} : vector<8x16xf32>, vector<16x1xf32>, vector<8x1xf32> -> vector<8x1xf32>
    %c0_22 = arith.constant 0 : index
    %c0_23 = arith.constant 0 : index
    %37 = vector.load %arg5[%c0_22, %c0_23] : memref<8x16xf32, #tpu.memory_space<vmem>>, vector<8x16xf32>
    %cst_24 = arith.constant dense<0.000000e+00> : vector<8x1xf32>
    %38 = tpu.matmul %37, %34, %cst_24 {dimension_numbers = #tpu.dot_dimension_numbers<[1], [0], [0], [1], [0, 0, 1, 1], [], []>} : vector<8x16xf32>, vector<16x1xf32>, vector<8x1xf32> -> vector<8x1xf32>
    %c0_25 = arith.constant 0 : index
    %c0_26 = arith.constant 0 : index
    %39 = vector.load %arg4[%c0_25, %c0_26] : memref<16x8xf32, #tpu.memory_space<vmem>>, vector<16x8xf32>
    %cst_27 = arith.constant dense<0.000000e+00> : vector<16x1xf32>
    %40 = tpu.matmul %39, %36, %cst_27 {dimension_numbers = #tpu.dot_dimension_numbers<[1], [0], [0], [1], [0, 0, 1, 1], [], []>} : vector<16x8xf32>, vector<8x1xf32>, vector<16x1xf32> -> vector<16x1xf32>
    %cst_28 = arith.constant 3.125000e-02 : f32
    %41 = vector.broadcast %cst_28 : f32 to vector<16x1xf32>
    %42 = arith.mulf %40, %41 : vector<16x1xf32>
    %c0_29 = arith.constant 0 : index
    %c0_30 = arith.constant 0 : index
    %43 = vector.load %arg4[%c0_29, %c0_30] : memref<16x8xf32, #tpu.memory_space<vmem>>, vector<16x8xf32>
    %cst_31 = arith.constant dense<0.000000e+00> : vector<16x1xf32>
    %44 = tpu.matmul %43, %38, %cst_31 {dimension_numbers = #tpu.dot_dimension_numbers<[1], [0], [0], [1], [0, 0, 1, 1], [], []>} : vector<16x8xf32>, vector<8x1xf32>, vector<16x1xf32> -> vector<16x1xf32>
    %cst_32 = arith.constant 3.125000e-02 : f32
    %45 = vector.broadcast %cst_32 : f32 to vector<16x1xf32>
    %46 = arith.mulf %44, %45 : vector<16x1xf32>
    %47 = arith.mulf %42, %42 : vector<16x1xf32>
    %48 = arith.subf %46, %47 : vector<16x1xf32>
    %cst_33 = arith.constant 0.000000e+00 : f32
    %49 = vector.broadcast %cst_33 : f32 to vector<16x1xf32>
    %50 = arith.maximumf %48, %49 : vector<16x1xf32>
    %cst_34 = arith.constant 9.99999974E-6 : f32
    %51 = vector.broadcast %cst_34 : f32 to vector<16x1xf32>
    %52 = arith.addf %50, %51 : vector<16x1xf32>
    %53 = math.rsqrt %52 : vector<16x1xf32>
    %54 = arith.mulf %53, %17 : vector<16x1xf32>
    %55 = arith.mulf %42, %54 : vector<16x1xf32>
    %56 = arith.subf %18, %55 : vector<16x1xf32>
    %57 = vector.extract_strided_slice %20 {offsets = [0, 0], sizes = [16, 16], strides = [1, 1]} : vector<16x128xf32> to vector<16x16xf32>
    %58 = vector.broadcast %54 : vector<16x1xf32> to vector<16x16xf32>
    %59 = arith.mulf %57, %58 : vector<16x16xf32>
    %60 = vector.broadcast %56 : vector<16x1xf32> to vector<16x16xf32>
    %61 = arith.addf %59, %60 : vector<16x16xf32>
    %cst_35 = arith.constant 2.000000e+01 : f32
    %62 = vector.broadcast %cst_35 : f32 to vector<16x16xf32>
    %63 = arith.minimumf %61, %62 : vector<16x16xf32>
    %64 = math.exp %63 : vector<16x16xf32>
    %cst_36 = arith.constant 2.000000e+00 : f32
    %65 = vector.broadcast %cst_36 : f32 to vector<16x16xf32>
    %66 = arith.addf %64, %65 : vector<16x16xf32>
    %67 = arith.mulf %64, %66 : vector<16x16xf32>
    %cst_37 = arith.constant 2.000000e+01 : f32
    %68 = vector.broadcast %cst_37 : f32 to vector<16x16xf32>
    %69 = arith.cmpf ogt, %61, %68 : vector<16x16xf32>
    %cst_38 = arith.constant 2.000000e+00 : f32
    %70 = vector.broadcast %cst_38 : f32 to vector<16x16xf32>
    %71 = arith.addf %67, %70 : vector<16x16xf32>
    %72 = arith.divf %67, %71 : vector<16x16xf32>
    %73 = arith.mulf %61, %72 : vector<16x16xf32>
    %74 = arith.select %69, %61, %73 : vector<16x16xi1>, vector<16x16xf32>
    %c0_39 = arith.constant 0 : index
    %c0_40 = arith.constant 0 : index
    %c0_41 = arith.constant 0 : index
    %75 = vector.load %arg6[%c0_39, %c0_40, %c0_41] : memref<1x16x16xf32, #tpu.memory_space<vmem>>, vector<1x16x16xf32>
    %76 = vector.shape_cast %75 : vector<1x16x16xf32> to vector<16x16xf32>
    %77 = vector.shape_cast %74 : vector<16x16xf32> to vector<1x16x16xf32>
    tpu.vector_store %arg6[%c0_39, %c0_40, %c0_41], %77 {strides = array<i32>} : memref<1x16x16xf32, #tpu.memory_space<vmem>>, vector<1x16x16xf32>,
    return
  }
  func.func @transform_0(%arg0: i32) -> (i32, i32, i32) {
    %c0_i32 = arith.constant 0 : i32
    %c0_i32_0 = arith.constant 0 : i32
    %c0_i32_1 = arith.constant 0 : i32
    return %arg0, %c0_i32, %c0_i32_0 : i32, i32, i32
  }
  func.func @transform_1(%arg0: i32) -> (i32, i32, i32) {
    %c0_i32 = arith.constant 0 : i32
    %c0_i32_0 = arith.constant 0 : i32
    %c0_i32_1 = arith.constant 0 : i32
    %c0_i32_2 = arith.constant 0 : i32
    return %c0_i32, %c0_i32_0, %c0_i32_1 : i32, i32, i32
  }
  func.func @transform_2(%arg0: i32) -> (i32, i32) {
    %c0_i32 = arith.constant 0 : i32
    %c0_i32_0 = arith.constant 0 : i32
    %c0_i32_1 = arith.constant 0 : i32
    return %c0_i32, %c0_i32_0 : i32, i32
  }
  func.func @transform_3(%arg0: i32) -> (i32, i32) {
    %c0_i32 = arith.constant 0 : i32
    %c0_i32_0 = arith.constant 0 : i32
    %c0_i32_1 = arith.constant 0 : i32
    return %c0_i32, %c0_i32_0 : i32, i32
  }
  func.func @transform_4(%arg0: i32) -> (i32, i32) {
    %c0_i32 = arith.constant 0 : i32
    %c0_i32_0 = arith.constant 0 : i32
    %c0_i32_1 = arith.constant 0 : i32
    return %c0_i32, %c0_i32_0 : i32, i32
  }
  func.func @transform_5(%arg0: i32) -> (i32, i32, i32) {
    %c0_i32 = arith.constant 0 : i32
    %c0_i32_0 = arith.constant 0 : i32
    %c0_i32_1 = arith.constant 0 : i32
    return %arg0, %c0_i32, %c0_i32_0 : i32, i32, i32
  }
}

</mosaic_0001>

<bundles_post_ra>
// kernel: tpu_custom_call.1
= control target key start
LH: loop header
LB: loop body
LE: loop exit
PB: predicated region body
PF: predicated region fallthrough
CT: control target
= control target key end

     0   :  { %10 = vsyncpa [#allocation3], 0  ;;  %s2063_s0 = inlined_call_operand.vmem [shape: f32[2,8,256], index: 0, kind: input, shape index: {}]   ;;  %s2064_s1 = inlined_call_operand.vmem [shape: f32[3,16,8], index: 1, kind: input, shape index: {}]   ;;  %s2065_s2 = inlined_call_operand.vmem [shape: f32[16,4], index: 2, kind: input, shape index: {}]   ;;  %s2066_s3 = inlined_call_operand.vmem [shape: f32[16,8], index: 3, kind: input, shape index: {}]   ;;  %s2067_s4 = inlined_call_operand.vmem [shape: f32[8,16], index: 4, kind: input, shape index: {}]   ;;  %s2068_s5 = inlined_call_operand.hbm [shape: f32[2,16,16], index: 5, kind: output, shape index: {}]  }
   0x1   :  { %12 = vsyncpa [#allocation3 + $0x1], 0  ;;  %s1713_s18 = smov 0   ;;  %s1715_s19 = smov 0  }
   0x2   :  { %s1717_s20 = smov 0   ;;  %s1719_s21 = smov 0  }
   0x3 LB: > { %s1734_s22 = sadd.s32 4294967295, %s1669_s21   ;;  %s1223_s23 = sadd.s32 4294967294, %s1669_s21   ;;  %s1669_s21 = sphi %s1719_s21, %s2101_s21   ;;  %s1665_s20 = sphi %s1717_s20, %s2100_s20   ;;  %s1661_s19 = sphi %s1715_s19, %s2099_s19   ;;  %s1657_s18 = sphi %s1713_s18, %s2098_s18  }
   0x4   : > { %s1738_s24 = sadd.s32 1, %s1669_s21   ;;  %s135_s25 = sadd.s32 1, %s1665_s20 }
   0x5   : > { %s132_s26 = ssub.s32 %s1669_s21, %s1738_s24  ;;  %p145_p0 = scmp.ne.s32.totalorder %s1665_s20, %s1661_s19 }
   0x6   : > { %p133_p1 = scmp.eq.s32.totalorder %s132_s26, 0  ;;  %p146_p2 = scmp.eq.s32.totalorder %s1734_s22, 1 }
   0x7   : > { %p151_p3 = scmp.ne.s32.totalorder %s1661_s19, %s1657_s18  ;;  %p152_p4 = scmp.eq.s32.totalorder %s1223_s23, 1 }
   0x8   : > { %s1749_s27 = scalar_select %p133_p1, %s1665_s20, %s135_s25  }
   0x9   : > { %p1751_p5 = por %p146_p2, %p145_p0  ;;  %p1755_p6 = por %p152_p4, %p151_p3 }
   0xa   : > { %p1226_p7 = scmp.ge.s32.totalorder %s1669_s21, 1  ;;  %p190_p8 = scmp.lt.s32.totalorder %s1669_s21, 3 }
   0xc   : > { %p191_p9 = pnand %p1226_p7, %p190_p8 }
   0xd   : > { %p218_p10 = scmp.lt.s32.totalorder (!%p191_p9), %s1734_s22, 1  ;;  %v1230_v0 = vld [vmem:[%s2064_s1 + $0x10] sm:$0xff] (!%p191_p9)  ;;  %vm2069_vm0 = vcmask (!%p191_p9), 64512   ;;  %s1671_s12 = smov (!%p191_p9), 127   ;;  %v1777_v3 = vld [vmem:[%s2065_s2 + $0x8] sm:$0xff] (!%p191_p9)  ;;  %v1782_v4 = vld [vmem:[%s2065_s2] sm:$0xff] (!%p191_p9)  ;;  %v509_v5 = vlaneseq (!%p191_p9) }
   0xe   : > { %194 = sbr.rel (%p191_p9) target bundleno = 1351 (0x547), region = 40  ;;  %1360 = vmatprep.mubr.msk.f32.mxu0 (!%p191_p9), %vm2069_vm0, %v1230_v0  ;;  %s1672_s13 = smov (!%p191_p9), 126   ;;  %v1673_v6 = vmov (!%p191_p9), 0   ;;  %v1674_v18 = vmov (!%p191_p9), 1.0|1.0   ;;  %v2078_v23 = vmov (!%p191_p9), 0 }
   0xf   : > { %1592 = vset.pattern.permute.xlu1 (!%p191_p9), %v1673_v6  ;;  %1591 = vset.pattern.permute.xlu0 (!%p191_p9), %v1673_v6  ;;  %v1786_v7 = vshrl.u32 (!%p191_p9), %v509_v5, 7  ;;  %v527_v8 = vand.u32 (!%p191_p9), 127, %v509_v5  ;;  %v1231_v37 = vld [vmem:[%s2064_s1 + $0x18] sm:$0xff] (!%p191_p9)  ;;  %v225_v38 = vld [vmem:[%s2064_s1] sm:$0xff] (!%p191_p9)  ;;  %v226_v40 = vld [vmem:[%s2064_s1 + $0x8] sm:$0xff] (!%p191_p9)  ;;  %v1675_v53 = vmov (!%p191_p9), 0.0|0.0  }
  0x10   : > { %v1236_v41 = vld [vmem:[%s2064_s1 + $0x20] sm:$0xff] (!%p191_p9)  ;;  %v1237_v42 = vld [vmem:[%s2064_s1 + $0x28] sm:$0xff] (!%p191_p9)  ;;  %v1677_v54 = vmov (!%p191_p9), 0.0   ;;  %s1678_s23 = smov (!%p191_p9), 2   ;;  %v1679_v30 = vmov (!%p191_p9), 2   ;;  %s215_s25 = sand.u32 (!%p191_p9), 1, %s1661_s19  }
  0x11   : > { %v511_v9 = vadd.s32 (!%p191_p9), 8, %v1786_v7  ;;  %v1789_v10 = vmul.u32 (!%p191_p9), 18, %v527_v8  ;;  %v512_v11 = vadd.s32 (!%p191_p9), 16, %v1786_v7  ;;  %v513_v13 = vadd.s32 (!%p191_p9), 24, %v1786_v7  ;;  %v762_v61 = vld [vmem:[%s2067_s4] sm:$0xff] (!%p191_p9)  ;;  %v908_v0 = vld [vmem:[%s2066_s3 + $0x8] sm:$0xff] (!%p191_p9) }
  0x12   : > { %v514_v14 = vadd.s32 (!%p191_p9), 32, %v1786_v7  ;;  %v515_v15 = vadd.s32 (!%p191_p9), 40, %v1786_v7  ;;  %v516_v17 = vadd.s32 (!%p191_p9), 48, %v1786_v7  ;;  %v517_v19 = vadd.s32 (!%p191_p9), 56, %v1786_v7  ;;  %v907_v62 = vld [vmem:[%s2066_s3] sm:$0xff] (!%p191_p9)  ;;  %s1227_s26 = sshll.u32 (!%p191_p9), %s215_s25, 4 }
  0x13   : > { %vm529_vm1 = vcmp.ge.s32.totalorder (!%p191_p9), %v1786_v7, %v1789_v10  ;;  %v1795_v12 = vadd.s32 (!%p191_p9), 16, %v1789_v10  ;;  %vm530_vm2 = vcmp.ge.s32.totalorder (!%p191_p9), %v511_v9, %v1789_v10  ;;  %vm531_vm6 = vcmp.ge.s32.totalorder (!%p191_p9), %v512_v11, %v1789_v10  ;;  %s1300_s30 = sshll.u32 (!%p191_p9), %s1734_s22, 8  ;;  %s217_s6 = scalar_lea.vmem (!%p191_p9), [#allocation2], %s1227_s26 }
  0x14   : > { %vm532_vm9 = vcmp.ge.s32.totalorder (!%p191_p9), %v513_v13, %v1789_v10  ;;  %vm533_vm13 = vcmp.ge.s32.totalorder (!%p191_p9), %v514_v14, %v1789_v10  ;;  %v518_v21 = vadd.s32 (!%p191_p9), 64, %v1786_v7  ;;  %v519_v22 = vadd.s32 (!%p191_p9), 72, %v1786_v7  ;;  %s2016_s10 = scalar_lea.hbm (!%p191_p9), %s2068_s5, %s1300_s30 }
  0x15   : > { %s219_s7 = scalar_select %p218_p10, %s1734_s22, 1  ;;  %vm546_vm3 = vcmp.lt.s32.totalorder %v1786_v7, %v1795_v12  ;;  %vm547_vm4 = vcmp.lt.s32.totalorder %v511_v9, %v1795_v12  ;;  %vm548_vm7 = vcmp.lt.s32.totalorder %v512_v11, %v1795_v12  ;;  %vm549_vm10 = vcmp.lt.s32.totalorder %v513_v13, %v1795_v12 }
  0x16   : > { %vm562_vm5 = vmand %vm529_vm1, %vm546_vm3  ;;  %vm550_vm14 = vcmp.lt.s32.totalorder %v514_v14, %v1795_v12  ;;  %vm534_vm1 = vcmp.ge.s32.totalorder %v515_v15, %v1789_v10  ;;  %v520_v24 = vadd.s32 80, %v1786_v7  ;;  %v521_v25 = vadd.s32 88, %v1786_v7  ;;  %s2022_s22 = scalar_lea.sflag [#allocation3], %s215_s25 }
  0x17   : > { %s1299_s8 = sshll.u32 %s219_s7, 4  ;;  %vm563_vm8 = vmand %vm530_vm2, %vm547_vm4  ;;  %vm551_vm2 = vcmp.lt.s32.totalorder %v515_v15, %v1795_v12  ;;  %v522_v27 = vadd.s32 96, %v1786_v7  ;;  %v523_v28 = vadd.s32 104, %v1786_v7  ;;  %v524_v43 = vadd.s32 112, %v1786_v7  ;;  %s1161_s7 = sshll.u32 %s217_s6, 4  ;;  %s2018_s7 = int_to_ptr.vmem [resolvable:$true] %s1161_s7 }
  0x18   : > { %s222_s11 = scalar_lea.vmem %s2063_s0, %s1299_s8  ;;  %vm1810_vm11 = vmpackc.low %vm563_vm8, %vm562_vm5  ;;  %vm535_vm5 = vcmp.ge.s32.totalorder %v516_v17, %v1789_v10  ;;  %vm536_vm8 = vcmp.ge.s32.totalorder %v517_v19, %v1789_v10  ;;  %v525_v44 = vadd.s32 120, %v1786_v7 }
  0x19   : > { %v1770_v1 = vld [vmem:[%s222_s11] sm:$0xff]  ;;  %v224_v2 = vld [vmem:[%s222_s11 + $0x8] sm:$0xff]  ;;  %1468 = vmatprep.subr.msk.bf16.mxu1 %vm1810_vm11, %v1674_v18  ;;  %vm564_vm12 = vmand %vm531_vm6, %vm548_vm7  ;;  %vm552_vm6 = vcmp.lt.s32.totalorder %v516_v17, %v1795_v12  ;;  %vm558_vm0 = vcmp.lt.s32.totalorder %v522_v27, %v1795_v12  ;;  %s1607_s11 = scalar_lea.vmem %s2018_s7, 256 }
  0x1a   : > { %232 = vrot.lane.b32.xlu0 %v1770_v1, %s1671_s12  ;;  %405 = vrot.lane.b32.xlu1 %v1770_v1, %s1672_s13  ;;  %vm565_vm15 = vmand %vm532_vm9, %vm549_vm10  ;;  %vm553_vm9 = vcmp.lt.s32.totalorder %v517_v19, %v1795_v12  ;;  %p1608_p11 = scmp.ne.s32.totalorder %s2018_s7, %s1607_s11 }
  0x1b   : > { %1470 = vmatpush3.bf16.msk.msra.mxu1 %vm1810_vm11, %v1674_v18  ;;  %vm1826_vm3 = vmpackc.low %vm565_vm15, %vm564_vm12 }
  0x1c   : > { %1472 = vmatprep.subr.msk.bf16.mxu1 %vm1826_vm3, %v1674_v18  ;;  %vm566_vm4 = vmand %vm533_vm13, %vm550_vm14  ;;  %vm537_vm13 = vcmp.ge.s32.totalorder %v518_v21, %v1789_v10  ;;  %vm554_vm14 = vcmp.lt.s32.totalorder %v518_v21, %v1795_v12  ;;  %p1609_p12 = pnand %p1608_p11, %p1751_p5 }
  0x1d   : > { %vm567_vm7 = vmand %vm534_vm1, %vm551_vm2  ;;  %vm538_vm1 = vcmp.ge.s32.totalorder %v519_v22, %v1789_v10  ;;  %vm555_vm2 = vcmp.lt.s32.totalorder %v519_v22, %v1795_v12 }
  0x1e   : > { %234 = vrot.lane.b32.xlu0 %v224_v2, %s1671_s12  ;;  %407 = vrot.lane.b32.xlu1 %v224_v2, %s1672_s13  ;;  %vm1842_vm10 = vmpackc.low %vm567_vm7, %vm566_vm4  ;;  %vm556_vm7 = vcmp.lt.s32.totalorder %v520_v24, %v1795_v12  ;;  %p1610_p13 = pneg %p1609_p12 }
  0x1f   : > { %1474 = vmatpush3.bf16.msk.msra.mxu1 %vm1826_vm3, %v1674_v18  ;;  %v2079_v23 = vsel %vm1842_vm10, 4294967295, %v2078_v23  ;;  %vm568_vm12 = vmand %vm535_vm5, %vm552_vm6  ;;  %vm539_vm6 = vcmp.ge.s32.totalorder %v520_v24, %v1789_v10 }
  0x20   : > { %1476 = vmatprep.subr.msk.bf16.mxu1 %vm1842_vm10, %v1674_v18  ;;  %vm569_vm15 = vmand %vm536_vm8, %vm553_vm9  ;;  %vm540_vm9 = vcmp.ge.s32.totalorder %v521_v25, %v1789_v10 }
  0x21   : > { %vm1855_vm4 = vmpackc.low %vm569_vm15, %vm568_vm12  ;;  %vm557_vm12 = vcmp.lt.s32.totalorder %v521_v25, %v1795_v12 }
  0x22   : > { %504 = vperm.xlu1 %1592, %v1777_v3   ;;  %499 = vperm.xlu0 %1591, %v1782_v4   ;;  %vm570_vm5 = vmand %vm537_vm13, %vm554_vm14  ;;  %vm541_vm14 = vcmp.ge.s32.totalorder %v522_v27, %v1789_v10 }
  0x23   : > { %1478 = vmatpush3.bf16.msk.msra.mxu1 %vm1842_vm10, %v1674_v18  ;;  %vm571_vm8 = vmand %vm538_vm1, %vm555_vm2  ;;  %vm542_vm1 = vcmp.ge.s32.totalorder %v523_v28, %v1789_v10  ;;  %vm559_vm2 = vcmp.lt.s32.totalorder %v523_v28, %v1795_v12 }
  0x24   : > { %1480 = vmatprep.subr.msk.bf16.mxu1 %vm1855_vm4, %v1674_v18  ;;  %vm1871_vm15 = vmpackc.low %vm571_vm8, %vm570_vm5 }
  0x25   : > { %vm572_vm13 = vmand %vm539_vm6, %vm556_vm7 }
  0x26   : > { %1081 = vrot.lane.b32.xlu0 %v1777_v3, %s1671_s12  ;;  %1079 = vrot.lane.b32.xlu1 %v1782_v4, %s1671_s12  ;;  %vm573_vm10 = vmand %vm540_vm9, %vm557_vm12  ;;  %vm2088_vm9 = vcmask 64512   ;;  %s1680_s12 = smov [#allocation2]  }
  0x27   : > { %1482 = vmatpush3.bf16.msk.msra.mxu1 %vm1855_vm4, %v1674_v18  ;;  %vm1885_vm5 = vmpackc.low %vm573_vm10, %vm572_vm13  ;;  %vm409_vm10 = vcmask 1031168   ;;  %s1611_s13 = sshll.u32 %s1680_s12, 4  ;;  %s1612_s13 = int_to_ptr.vmem [resolvable:$false] %s1611_s13 }
  0x28   : > { %1484 = vmatprep.subr.msk.bf16.mxu1 %vm1871_vm15, %v1674_v18  ;;  %vm574_vm6 = vmand %vm541_vm14, %vm558_vm0  ;;  %vm236_vm0 = vcmask 1039360   ;;  %s1613_s14 = scalar_lea.vmem %s1612_s13, 512  ;;  %p1614_p0 = scmp.lt.s32.totalorder %s2018_s7, %s1612_s13 }
  0x29   : > { %vm575_vm7 = vmand %vm542_vm1, %vm559_vm2  ;;  %vm2093_vm2 = vnez %v2079_v23  ;;  %p1615_p1 = scmp.lt.s32.totalorder %s1613_s14, %s1607_s11 }
  0x2a   : > { %vm1895_vm8 = vmpackc.low %vm575_vm7, %vm574_vm6 }
  0x2b   : > { %1486 = vmatpush3.bf16.msk.msra.mxu1 %vm1871_vm15, %v1674_v18  ;;  %vm2089_vm12 = vmmov %vm2088_vm9  ;;  %p1616_p2 = por %p1615_p1, %p1614_p0 }
  0x2c   : > { %1488 = vmatprep.subr.msk.bf16.mxu1 %vm1885_vm5, %v1674_v18  ;;  %vm2090_vm13 = vmmov %vm2088_vm9 }
  0x2d   : > { %vm2091_vm14 = vmmov %vm2088_vm9  ;;  %p1617_p3 = pnand %p1616_p2, %p1610_p13 }
  0x2e   : > { %vm2092_vm1 = vmmov %vm2088_vm9 }
  0x2f   : > { %1490 = vmatpush3.bf16.msk.msra.mxu1 %vm1885_vm5, %v1674_v18 }
  0x30   : > { %1492 = vmatprep.subr.msk.bf16.mxu1 %vm1895_vm8, %v1674_v18 }
  0x33   : > { %1494 = vmatpush3.bf16.msk.msra.mxu1 %vm1895_vm8, %v1674_v18 }
  0x8c   : > { %v233_v32 = vpop.permute.xlu0 %232  ;;  %v406_v33 = vpop.permute.xlu1 %405 }
  0x90   : > { %v235_v34 = vpop.permute.xlu0 %234  ;;  %v408_v35 = vpop.permute.xlu1 %407 }
  0x91   : > { %v237_v36 = vsel %vm236_vm0, %v233_v32, %v235_v34  ;;  %v410_v39 = vsel %vm409_vm10, %v406_v33, %v408_v35  ;;  %vm763_vm0 = vcmask 130048   ;;  %vm2094_vm10 = vmmov %vm2092_vm1 }
  0x92   : > { %1358 = vmatprep.subr.mxu0 %v237_v36 }
  0x93   : > { %1359 = vmatpush3.msra.mxu0 %v237_v36 }
  0x94   : > { %1361 = vmatmul.mubr.msk.f32.vlgmr.msra.gmra.mrb[0].mxu0 %vm2088_vm9, %v1231_v37  ;;  %1363 = vmatprep.subr.mxu0 %v1770_v1  ;;  %vm2095_vm9 = vmmov %vm2092_vm1 }
  0x95   : > { %1364 = vmatpush3.msra.mxu0 %v1770_v1  ;;  %1365 = vmatprep.mubr.msk.f32.mxu0 %vm2089_vm12, %v225_v38  ;;  %vm2096_vm12 = vmmov %vm2092_vm1 }
  0x96   : > { %1368 = vmatprep.subr.mxu0 %v410_v39 }
  0x9c   : > { %1366 = vmatmul.mubr.msk.f32.vlgmr.msra.gmra.mrb[0].mxu0 %vm2090_vm13, %v226_v40  ;;  %vm2097_vm13 = vmmov %vm2092_vm1 }
  0x9d   : > { %1369 = vmatpush3.msra.mxu0 %v410_v39  ;;  %1370 = vmatprep.mubr.msk.f32.mxu0 %vm2091_vm14, %v1236_v41 }
  0x9e   : > { %1500 = vmatprep.subr.msk.bf16.mxu0 %vm1810_vm11, %v1674_v18 }
  0xa1   : > { %v505_v45 = vpop.permute.xlu1 %504  ;;  %v500_v46 = vpop.permute.xlu0 %499 }
  0xa4   : > { %1371 = vmatmul.mubr.msk.f32.vlgmr.msra.gmra.mrb[0].mxu0 %vm2092_vm1, %v1237_v42 }
  0xa5   : > { %1502 = vmatpush3.bf16.msk.msra.mxu0 %vm1810_vm11, %v1674_v18  ;;  %vm543_vm11 = vcmp.ge.s32.totalorder %v524_v43, %v1789_v10  ;;  %v1082_v22 = vpop.permute.xlu0 %1081  ;;  %v1080_v23 = vpop.permute.xlu1 %1079 }
  0xa6   : > { %1504 = vmatprep.subr.msk.bf16.mxu0 %vm1826_vm3, %v1674_v18 }
  0xa9   : > { %1506 = vmatpush3.bf16.msk.msra.mxu0 %vm1826_vm3, %v1674_v18  ;;  %vm544_vm3 = vcmp.ge.s32.totalorder %v525_v44, %v1789_v10 }
  0xaa   : > { %1508 = vmatprep.subr.msk.bf16.mxu0 %vm2093_vm2, %v1674_v18 }
  0xad   : > { %1510 = vmatpush3.bf16.msk.msra.mxu0 %vm2093_vm2, %v1674_v18 }
  0xae   : > { %1512 = vmatprep.subr.msk.bf16.mxu0 %vm1855_vm4, %v1674_v18 }
  0xb1   : > { %1514 = vmatpush3.bf16.msk.msra.mxu0 %vm1855_vm4, %v1674_v18  ;;  %vm560_vm4 = vcmp.lt.s32.totalorder %v524_v43, %v1795_v12 }
  0xb2   : > { %1516 = vmatprep.subr.msk.bf16.mxu0 %vm1871_vm15, %v1674_v18 }
  0xb5   : > { %1518 = vmatpush3.bf16.msk.msra.mxu0 %vm1871_vm15, %v1674_v18  ;;  %vm561_vm15 = vcmp.lt.s32.totalorder %v525_v44, %v1795_v12 }
  0xb6   : > { %1520 = vmatprep.subr.msk.bf16.mxu0 %vm1885_vm5, %v1674_v18  ;;  %vm577_vm6 = vmand %vm544_vm3, %vm561_vm15 }
  0xb9   : > { %1522 = vmatpush3.bf16.msk.msra.mxu0 %vm1885_vm5, %v1674_v18  ;;  %vm576_vm5 = vmand %vm543_vm11, %vm560_vm4 }
  0xba   : > { %1524 = vmatprep.subr.msk.bf16.mxu0 %vm1895_vm8, %v1674_v18  ;;  %vm1495_vm7 = vmpackc.low %vm577_vm6, %vm576_vm5 }
  0xbb   : > { %1496 = vmatprep.subr.msk.bf16.mxu1 %vm1495_vm7, %v1674_v18 }
  0xbc   : > { %1498 = vmatpush3.bf16.msk.msra.mxu1 %vm1495_vm7, %v1674_v18 }
  0xbd   : > { %1526 = vmatpush3.bf16.msk.msra.mxu0 %vm1895_vm8, %v1674_v18  ;;  %1531 = vmatprep.subr.bf16.mxu1 %v1675_v53  ;;  %vm1676_vm8 = vmmov 0  }
  0xbe   : > { %1528 = vmatprep.subr.msk.bf16.mxu0 %vm1495_vm7, %v1674_v18 }
  0xc1   : > { %1530 = vmatpush3.bf16.msk.msra.mxu0 %vm1495_vm7, %v1674_v18 }
 0x177   : > { %v1372_v47 = vpop.f32.mrb[0].mxu0 }
 0x178   : > { %v1982_v48 = vadd.f32 %v1372_v47, %v505_v45  ;;  %v484_v49 = vpop.f32.mrb[1].mxu0 }
 0x179   : > { %v1984_v50 = vadd.f32 %v500_v46, %v484_v49 }
 0x17a   : > { %v686_v52 = vmul.f32 %v1982_v48, %v1982_v48 }
 0x17b   : > { %1405 = vmatprep.mubr.f32.mxu1 %v1984_v50  ;;  %v685_v51 = vmul.f32 %v1984_v50, %v1984_v50 }
 0x17c   : > { %1406 = vmatmul.mubr.f32.vlgmr.msra.gmra.mrb[0].mxu1 %v1982_v48 }
 0x17d   : > { %1440 = vmatprep.mubr.f32.mxu0 %v685_v51  ;;  %1447 = vmatprep.mubr.msk.f32.mxu1 %vm1676_vm8, %v1677_v54 }
 0x17e   : > { %1441 = vmatmul.mubr.f32.vlgmr.msra.gmra.mrb[2].mxu0 %v686_v52 }
 0x17f   : > { %1464 = vmatprep.mubr.msk.f32.mxu0 %vm2095_vm9, %v907_v62 }
 0x24f   : > { %v1407_v55 = vpop.f32.mrb[0].mxu1 }
 0x250   : > { %v676_v56 = vpop.f32.mrb[1].mxu1 }
 0x251   : > { %v1532_v57 = vpack.c.bf16 %v1407_v55, %v676_v56  ;;  %v1442_v58 = vpop.f32.mrb[2].mxu0 }
 0x252   : > { %v753_v59 = vpop.f32.mrb[3].mxu0 }
 0x253   : > { %v1535_v60 = vpack.c.bf16 %v1442_v58, %v753_v59  ;;  %1533 = vmatpush3.bf16.msra.mxu1 %v1532_v57 }
 0x254   : > { %1534 = vmatprep.subr.bf16.mxu1 %v1675_v53 }
 0x256   : > { %1448 = vmatmul.mubr.msk.f32.vlgmr.msra.gmra.mrb[2].mxu1 %vm763_vm0, %v762_v61 }
 0x257   : > { %1536 = vmatpush3.bf16.msra.mxu1 %v1535_v60  ;;  %1454 = vmatprep.mubr.msk.f32.mxu1 %vm1676_vm8, %v1677_v54 }
 0x25a   : > { %1455 = vmatmul.mubr.msk.f32.vlgmr.msra.gmra.mrb[4].mxu1 %vm763_vm0, %v762_v61 }
 0x25b   : > { %1459 = vmatprep.mubr.msk.f32.mxu1 %vm2094_vm10, %v907_v62 }
 0x329   : > { %v833_v63 = vpop.f32.mrb[2].mxu1 }
 0x32a   : > { %v1449_v1 = vpop.f32.mrb[3].mxu1  ;;  %1457 = vmatprep.subr.mxu1 %v833_v63 }
 0x32b   : > { %1458 = vmatpush3.msra.mxu1 %v833_v63 }
 0x32c   : > { %1460 = vmatmul.mubr.msk.f32.vlgmr.msra.gmra.mrb[6].mxu1 %vm2096_vm12, %v908_v0 }
 0x32d   : > { %v903_v2 = vpop.f32.mrb[4].mxu1 }
 0x32e   : > { %v1456_v5 = vpop.f32.mrb[5].mxu1  ;;  %1462 = vmatprep.subr.mxu0 %v903_v2 }
 0x32f   : > { %1463 = vmatpush3.msra.mxu0 %v903_v2 }
 0x330   : > { %1465 = vmatmul.mubr.msk.f32.vlgmr.msra.gmra.mrb[4].mxu0 %vm2097_vm13, %v908_v0 }
 0x3ff   : > { %v1461_v6 = vpop.f32.mrb[6].mxu1 }
 0x400   : > { %v991_v7 = vmul.f32 0.03125, %v1461_v6  ;;  %v981_v8 = vpop.f32.mrb[7].mxu1 }
 0x401   : > { %v990_v9 = vmul.f32 0.03125, %v981_v8 }
 0x402   : > { %v1070_v10 = vmul.f32 %v991_v7, %v991_v7 }
 0x403   : > { %v1069_v11 = vmul.f32 %v990_v9, %v990_v9  ;;  %v1466_v12 = vpop.f32.mrb[4].mxu0 }
 0x404   : > { %v1068_v13 = vmul.f32 0.03125, %v1466_v12  ;;  %v1058_v14 = vpop.f32.mrb[5].mxu0 }
 0x405   : > { %v1067_v15 = vmul.f32 0.03125, %v1058_v14 }
 0x406   : > { %v1072_v16 = vsub.f32 %v1068_v13, %v1070_v10 }
 0x407   : > { %v1071_v17 = vsub.f32 %v1067_v15, %v1069_v11 }
 0x408   : > { %v1074_v18 = vmax.f32 %v1072_v16, 0.0 }
 0x409   : > { %v1073_v19 = vmax.f32 %v1071_v17, 0.0 }
 0x40a   : > { %v1076_v20 = vadd.f32 1e-05, %v1074_v18 }
 0x40b   : > { %v1075_v21 = vadd.f32 1e-05, %v1073_v19 }
 0x40c   : > { %1595 = vrsqrt.f32 %v1076_v20 }
 0x40d   : > { %1597 = vrsqrt.f32 %v1075_v21 }
 0x416   : > { %v1596_v24 = vpop.eup %1595 }
 0x417   : > { %v1598_v25 = vpop.eup %1597  ;;  %v1086_v26 = vmul.f32 %v1596_v24, %v1082_v22 }
 0x418   : > { %v1085_v27 = vmul.f32 %v1598_v25, %v1080_v23 }
 0x419   : > { %v1088_v28 = vmul.f32 %v1086_v26, %v991_v7 }
 0x41a   : > { %v1087_v29 = vmul.f32 %v1085_v27, %v990_v9 }
 0x41b   : > { %1093 = vrot.lane.b32.xlu0 %v1088_v28, %s1678_s23 }
 0x41c   : > { %1091 = vrot.lane.b32.xlu1 %v1087_v29, %s1678_s23 }
 0x41f   : > { %1106 = vperm.xlu0 %1591, %v1086_v26  }
 0x420   : > { %1101 = vperm.xlu1 %1592, %v1085_v27  }
 0x423   : > { %1594 = vset.pattern.permute.xlu0 %v1679_v30 }
 0x424   : > { %1593 = vset.pattern.permute.xlu1 %v1679_v30 }
 0x48d   : > { %v1094_v31 = vpop.permute.xlu0 %1093 }
 0x48e   : > { %v1098_v32 = vsub.f32 %v1777_v3, %v1094_v31  ;;  %v1092_v33 = vpop.permute.xlu1 %1091 }
 0x48f   : > { %v1097_v34 = vsub.f32 %v1782_v4, %v1092_v33 }
 0x490   : > { %1118 = vperm.xlu0 %1594, %v1098_v32  }
 0x491   : > { %1113 = vperm.xlu1 %1593, %v1097_v34  }
 0x49e   : > { %v1107_v35 = vpop.permute.xlu0 %1106 }
 0x49f   : > { %v1102_v36 = vpop.permute.xlu1 %1101  ;;  %v1110_v37 = vmul.f32 %v1107_v35, %v1982_v48 }
 0x4a0   : > { %v1109_v38 = vmul.f32 %v1102_v36, %v1984_v50 }
 0x50f   : > { %v1119_v39 = vpop.permute.xlu0 %1118 }
 0x510   : > { %v1122_v40 = vadd.f32 %v1119_v39, %v1110_v37  ;;  %v1114_v41 = vpop.permute.xlu1 %1113 }
 0x511   : > { %v1121_v42 = vadd.f32 %v1114_v41, %v1109_v38 }
 0x512   : > { %v1124_v43 = vmin.f32 %v1122_v40, 20.0  ;;  %vm1134_vm14 = vcmp.gt.f32.partialorder %v1122_v40, 20.0 }
 0x513   : > { %v1123_v44 = vmin.f32 %v1121_v42, 20.0  ;;  %vm1133_vm1 = vcmp.gt.f32.partialorder %v1121_v42, 20.0 }
 0x514   : > { %v1127_v45 = vmul.f32 1.442695, %v1124_v43 }
 0x515   : > { %v1125_v3 = vmul.f32 1.442695, %v1123_v44 }
 0x516   : > { %1599 = vpow2.f32 %v1127_v45 }
 0x517   : > { %1601 = vpow2.f32 %v1125_v3 }
 0x520   : > { %v1600_v4 = vpop.eup %1599 }
 0x521   : > { %v1602_v46 = vpop.eup %1601  ;;  %v1130_v47 = vadd.f32 2.0, %v1600_v4 }
 0x522   : > { %v1129_v49 = vadd.f32 2.0, %v1602_v46 }
 0x523   : > { %v1132_v51 = vmul.f32 %v1600_v4, %v1130_v47 }
 0x524   : > { %v1131_v48 = vmul.f32 %v1602_v46, %v1129_v49 }
 0x525   : > { %v1136_v52 = vadd.f32 2.0, %v1132_v51 }
 0x526   : > { %v1135_v50 = vadd.f32 2.0, %v1131_v48 }
 0x527   : > { %1603 = vrcp.f32 %v1136_v52 }
 0x528   : > { %1605 = vrcp.f32 %v1135_v50 }
 0x531   : > { %v1604_v53 = vpop.eup %1603 }
 0x532   : > { %v1606_v54 = vpop.eup %1605  ;;  %v1140_v55 = vmul.f32 %v1604_v53, %v1132_v51 }
 0x533   : > { %v1138_v56 = vmul.f32 %v1606_v54, %v1131_v48 }
 0x534   : > { %v1142_v57 = vmul.f32 %v1140_v55, %v1122_v40 }
 0x535   : > { %v1141_v58 = vmul.f32 %v1138_v56, %v1121_v42 }
 0x536   : > { %v1144_v59 = vsel %vm1134_vm14, %v1122_v40, %v1142_v57 }
 0x537   : > { %1146 = vst.msk [vmem:[%s217_s6 + $0x8] sm:$0xff] %vm763_vm0, %v1144_v59  ;;  %v1143_v60 = vsel %vm1133_vm1, %v1121_v42, %v1141_v58 }
 0x538   : > { %1145 = vst.msk [vmem:[%s217_s6] sm:$0xff] %vm763_vm0, %v1143_v60 }
 0x539   : > { %1620 = shalt.err (!%p1617_p3)
}
 0x53a   : > { %s1621_s15 = scalar_lea.hbm %s2016_s10, 256  ;;  %s1625_s23 = scalar_lea.hbm %s2068_s5, 512 }
 0x53b   : > { %p1622_p4 = scmp.ne.s32.totalorder %s2016_s10, %s1621_s15  ;;  %p1626_p9 = scmp.lt.u32.totalorder %s2016_s10, %s2068_s5 }
 0x53c   : > { %p1627_p10 = scmp.lt.u32.totalorder %s1625_s23, %s1621_s15  ;;  %p1629_p12 = scmp.lt.u32.totalorder %s1621_s15, %s2016_s10 }
 0x53d   : > { %p1623_p7 = pnand %p1622_p4, %p1751_p5 }
 0x53e   : > { %p1628_p11 = por %p1627_p10, %p1626_p9 }
 0x53f   : > { %p1624_p8 = pneg %p1623_p7 }
 0x540   : > { %p1630_p13 = por %p1629_p12, %p1628_p11 }
 0x542   : > { %p1631_p0 = pnand %p1630_p13, %p1624_p8 }
 0x544   : > { %1634 = shalt.err (!%p1631_p0)
}
 0x545   : > { %s1681_s30 = smov 128   ;;  %s1682_s6 = smov 8  }
 0x546   : > { %1541 = dma.vmem_to_hbm [thread:$0]  (%p1751_p5), %s2018_s7, 256, %s2016_s10, %s2022_s22, %s1681_s30, %s1681_s30, %s1682_s6  }
 0x547 PF: > { %p1547_p1 = scmp.ge.s32.totalorder %s1669_s21, 2  ;;  %s1176_s8 = sand.u32 1, %s1657_s18  }
 0x548   : > { %s1177_s9 = scalar_lea.sflag [#allocation3], %s1176_s8 }
 0x549   : > { %p1544_p2 = pnand %p1547_p1, %p1755_p6 }
 0x54b   : > { %1652 = dma.done.wait (!%p1544_p2), %s1177_s9, 256  }
 0x54c   : > { %1654 = vsyncadd (!%p1544_p2), %s1177_s9, 4294967040  ;;  %p15_p3 = scmp.ge.s32.totalorder %s1738_s24, 4   ;;  %s2098_s18 = smov %s1661_s19 }
 0x54d   : > { %s2099_s19 = smov %s1665_s20  ;;  %s2100_s20 = smov %s1749_s27 }
 0x54e   : > { %s2101_s21 = smov %s1738_s24  ;;  %17 = sbr.rel (!%p15_p3) target bundleno = 3 (0x3), region = 77 }
 0x555   :  { %1182 = vsyncpa [#allocation3], 1 }
 0x556   :  { %1184 = vsyncpa [#allocation3 + $0x1], 1 }

</bundles_post_ra>
